<compile_context>
chip_gen: v6e
topology: v6e:2x2x1
jax: 0.10.0
libtpu: 0.0.40
codegen_flags: <defaults>
</compile_context>

<pallas_src>
import functools
import math

import jax
import jax.numpy as jnp
from jax.experimental import pallas as pl
from jax.experimental.pallas import tpu as pltpu

_LANE = 128
_SUBLANE = 8


def _identity_cast_kernel(x_ref, o_ref):
    # The whole forward pass: elementwise cast to float32.
    o_ref[...] = x_ref[...].astype(jnp.float32)


def _round_down(x, m):
    return (x // m) * m


def _round_up(x, m):
    return ((x + m - 1) // m) * m


def _largest_aligned_divisor(n, cap, align):
    """Largest d with n % d == 0, d % align == 0, d <= cap (0 if none)."""
    best = 0
    i = 1
    while i * i <= n:
        if n % i == 0:
            for d in (i, n // i):
                if d <= cap and d % align == 0 and d > best:
                    best = d
        i += 1
    return best


@functools.lru_cache(maxsize=1)
def _device_tuning():
    """Return (vmem_budget_bytes, multi_tensorcore)."""
    budget = 8 * 1024 * 1024          # safe under v5e's 16 MiB scoped default
    multi_tc = False
    try:
        kind = (jax.devices()[0].device_kind or "").lower()
    except Exception:
        kind = ""
    if "v6" in kind:
        budget = 16 * 1024 * 1024     # v6e scoped default is 32 MiB
    if any(tag in kind for tag in ("v7", "tpu7", "7x")):
        budget = 20 * 1024 * 1024     # v7x: 32 MiB scoped / 64 MiB physical
        multi_tc = True               # 2 TensorCores share HBM on v7x
    try:
        cap = getattr(pltpu.get_tpu_info(), "vmem_capacity_bytes", None)
        if cap:
            budget = min(budget, max(4 * 1024 * 1024, cap // 3))
    except Exception:
        pass
    return budget, multi_tc


def _choose_blocks(rows, cols, in_itemsize, budget, multi_tc):
    """Pick (block_rows, block_cols) so 2x(double-buffered input tile + f32
    output tile) fits the VMEM budget, tiles stay (8,128)/native-tile aligned,
    blocks prefer dividing the array evenly, and (v7x only) the grid gets at
    least two parallel steps so both TensorCores drive HBM."""
    bpe = 2 * (in_itemsize + 4)                    # in + f32 out, double-buffered
    native_sub = max(_SUBLANE, 32 // max(1, in_itemsize))  # 8 f32 / 16 bf16 / 32 i8

    # ---- column tile ----
    min_rows = min(rows, _SUBLANE)
    if cols <= _LANE or cols * min_rows * bpe <= budget:
        block_cols = cols                          # full extent is always legal
    else:
        block_cols = max(_LANE, _round_down(budget // (min_rows * bpe), _LANE))
        if cols % _LANE == 0:
            d = _largest_aligned_divisor(cols, block_cols, _LANE)
            if d >= max(_LANE, block_cols // 2):
                block_cols = d

    # ---- row tile ----
    per_row = min(block_cols, cols) * bpe
    max_rows = max(1, budget // per_row)

    if rows <= max_rows:
        block_rows = rows                          # whole extent fits the budget
        # v7x only: two near-equal, natively-aligned halves for megacore sharding.
        if multi_tc and block_cols >= cols and rows >= 2 * native_sub:
            half = _round_up(pl.cdiv(rows, 2), native_sub)
            if half < rows:
                block_rows = half
    else:
        align = native_sub if max_rows >= native_sub else _SUBLANE
        block_rows = max(_SUBLANE, _round_down(max_rows, align))
        block_rows = min(block_rows, rows)
        d = _largest_aligned_divisor(rows, block_rows, align)
        if d >= max(align, block_rows // 2):       # prefer no ragged last tile
            block_rows = d
    return block_rows, block_cols


def identity_feature_encoder(binary_feature, *, small_threshold_bytes=256 * 1024):
    """Pallas implementation of IdentityFeatureEncoder.forward.

    Args:
      binary_feature: array of any numeric/bool dtype (typically
        [batch, binary_input_size]).
    Returns:
      float32 array of identical shape.
    """
    orig_shape = binary_feature.shape
    total = int(math.prod(orig_shape)) if orig_shape else 1

    # Empty arrays / scalars: nothing to tile.
    if total == 0 or binary_feature.ndim == 0:
        return binary_feature.astype(jnp.float32)

    # Bool: a single fused XLA convert is already 1B-in/4B-out (roofline); the
    # old astype(int8) pre-pass added a full extra HBM round trip.
    # TODO(synk): load bool refs directly in-kernel once i1 VMEM loads are
    # guaranteed across generations, to keep even this case inside Pallas.
    if binary_feature.dtype == jnp.bool_:
        return binary_feature.astype(jnp.float32)

    in_itemsize = jnp.dtype(binary_feature.dtype).itemsize

    # Small-array fast path: at the module's natural [batch, binary_input_size]
    # sizes the pallas_call fixed cost and un-fusible HBM round trip dominate.
    if total * (in_itemsize + 4) < small_threshold_bytes:
        return binary_feature.astype(jnp.float32)

    budget, multi_tc = _device_tuning()

    # Lane-dense path: view the flat element stream as (rows, 128*k) so every
    # store is an unmasked full-lane vst and DMAs are full width.  Pure layout
    # plumbing — the op is elementwise, so reshape-in / reshape-out is exact.
    cols = None
    for cand in (_LANE * 8, _LANE * 4, _LANE * 2, _LANE):
        if total % cand == 0:
            cols = cand
            break

    if cols is not None:
        rows = total // cols
        x2d = binary_feature.reshape(rows, cols)
    else:
        # Fallback: keep a 2-D layout whose last dim equals the feature dim.
        if binary_feature.ndim <= 1:
            x2d = binary_feature.reshape(1, -1)
        else:
            x2d = binary_feature.reshape(-1, orig_shape[-1])
        rows, cols = x2d.shape

    block_rows, block_cols = _choose_blocks(rows, cols, in_itemsize, budget, multi_tc)
    grid = (pl.cdiv(rows, block_rows), pl.cdiv(cols, block_cols))

    out2d = pl.pallas_call(
        _identity_cast_kernel,
        out_shape=jax.ShapeDtypeStruct((rows, cols), jnp.float32),
        grid_spec=pltpu.PrefetchScalarGridSpec(
            num_scalar_prefetch=0,
            grid=grid,
            in_specs=[pl.BlockSpec((block_rows, block_cols), lambda i, j: (i, j))],
            out_specs=pl.BlockSpec((block_rows, block_cols), lambda i, j: (i, j)),
        ),
        compiler_params=pltpu.CompilerParams(
            dimension_semantics=("parallel", "parallel")),
    )(x2d)

    return out2d.reshape(orig_shape)


if __name__ == "__main__":
    key = jax.random.PRNGKey(0)
    k1, k2, k3, k4 = jax.random.split(key, 4)

    # Case 1: the module's natural small shape [batch, binary_input_size]
    # -> small-array fast path (fused XLA cast).
    batch, binary_input_size = 2, 32
    x_small = jax.random.bernoulli(k1, 0.5, (batch, binary_input_size)).astype(jnp.int32)
    out_small = jax.block_until_ready(identity_feature_encoder(x_small))
    assert out_small.shape == x_small.shape and out_small.dtype == jnp.float32
    assert jnp.array_equal(out_small, x_small.astype(jnp.float32))

    # Case 2: larger batch -> Pallas lane-dense path (total % 128 == 0).
    x_big = jax.random.bernoulli(k2, 0.5, (512, 128)).astype(jnp.int32)
    out_big = jax.block_until_ready(identity_feature_encoder(x_big))
    assert out_big.shape == x_big.shape and out_big.dtype == jnp.float32
    assert jnp.array_equal(out_big, x_big.astype(jnp.float32))

    # Case 3: odd feature width (total not a multiple of 128) -> fallback 2-D tiling.
    x_odd = jax.random.bernoulli(k3, 0.5, (700, 100)).astype(jnp.int8)
    out_odd = jax.block_until_ready(identity_feature_encoder(x_odd))
    assert out_odd.shape == x_odd.shape and out_odd.dtype == jnp.float32
    assert jnp.array_equal(out_odd, x_odd.astype(jnp.float32))

    # Case 4: bool input (the module's literal use case) -> fused XLA cast path.
    x_bool = jax.random.bernoulli(k4, 0.5, (batch, binary_input_size))
    out_bool = jax.block_until_ready(identity_feature_encoder(x_bool))
    assert out_bool.dtype == jnp.float32
    assert jnp.array_equal(out_bool, x_bool.astype(jnp.float32))

    print("KERNEL_OK")
</pallas_src>

<mosaic_0001>
module attributes {stable_mosaic.version = 11 : i64} {
  func.func @_identity_cast_kernel(%arg0: i32, %arg1: i32, %arg2: memref<64x1024xi32, #tpu.memory_space<vmem>>, %arg3: memref<64x1024xf32, #tpu.memory_space<vmem>>) attributes {dimension_semantics = [#tpu.dimension_semantics<parallel>, #tpu.dimension_semantics<parallel>], iteration_bounds = array<i64: 1, 1>, scalar_prefetch = 0 : i64, scratch_operands = 0 : i64, tpu.core_type = #tpu.core_type<tc>, window_params = [{transform_indices = @transform_0, window_bounds = array<i64: 64, 1024>}, {transform_indices = @transform_1, window_bounds = array<i64: 64, 1024>}]} {
    %c0 = arith.constant 0 : index
    %c0_0 = arith.constant 0 : index
    %0 = vector.load %arg2[%c0, %c0_0] : memref<64x1024xi32, #tpu.memory_space<vmem>>, vector<64x1024xi32>
    %1 = arith.sitofp %0 : vector<64x1024xi32> to vector<64x1024xf32>
    %c0_1 = arith.constant 0 : index
    %c0_2 = arith.constant 0 : index
    %2 = vector.load %arg3[%c0_1, %c0_2] : memref<64x1024xf32, #tpu.memory_space<vmem>>, vector<64x1024xf32>
    tpu.vector_store %arg3[%c0_1, %c0_2], %1 {strides = array<i32>} : memref<64x1024xf32, #tpu.memory_space<vmem>>, vector<64x1024xf32>,
    return
  }
  func.func @transform_0(%arg0: i32, %arg1: i32) -> (i32, i32) {
    %c0_i32 = arith.constant 0 : i32
    return %arg0, %arg1 : i32, i32
  }
  func.func @transform_1(%arg0: i32, %arg1: i32) -> (i32, i32) {
    %c0_i32 = arith.constant 0 : i32
    return %arg0, %arg1 : i32, i32
  }
}

</mosaic_0001>

<bundles_post_ra>
// kernel: tpu_custom_call.1
= control target key start
LH: loop header
LB: loop body
LE: loop exit
PB: predicated region body
PF: predicated region fallthrough
CT: control target
= control target key end

     0   :  { %6 = vsyncpa [#allocation3], 0  ;;  %s306_s0 = inlined_call_operand.hbm [shape: s32[64,1024], index: 0, kind: input, shape index: {}]   ;;  %s307_s1 = inlined_call_operand.hbm [shape: f32[64,1024], index: 1, kind: output, shape index: {}]  }
   0x1   :  { %7 = vsyncpa [#allocation4], 0  ;;  %s280_s6 = smov [#allocation2]  }
   0x2   :  { %s13_s7 = sshll.u32 %s280_s6, 4  ;;  %s14_s7 = int_to_ptr.vmem [resolvable:$true] %s13_s7 }
   0x3   :  { %s244_s8 = scalar_lea.vmem %s14_s7, 8192  ;;  %p249_p1 = scmp.lt.s32.totalorder %s14_s7, %s14_s7 }
   0x4   :  { %p245_p0 = scmp.ne.s32.totalorder %s14_s7, %s244_s8  ;;  %p250_p2 = scmp.lt.s32.totalorder %s244_s8, %s244_s8 }
   0x6   :  { %p251_p3 = por %p250_p2, %p249_p1 }
   0x8   :  { %p252_p4 = pnand %p251_p3, %p245_p0 }
   0xa   :  { %255 = shalt.err (!%p252_p4)
}
   0xb   :  { %s281_s9 = smov 1024   ;;  %s282_s10 = smov 64  }
   0xc   :  { %19 = dma.hbm_to_vmem [thread:$0]  %s306_s0, 8192, %s14_s7, [#allocation3], %s281_s9, %s281_s9, %s282_s10  }
   0xd   :  { %276 = dma.done.wait [#allocation3], 8192  }
   0xe   :  { %277 = vsyncadd [#allocation3], 4294959104  ;;  %v23_v0 = vld [vmem:[#allocation2] sm:$0xff]  ;;  %v24_v1 = vld [vmem:[#allocation2 + $0x8] sm:$0xff]  ;;  %s283_s0 = smov [#allocation5]  }
   0xf   :  { %v25_v2 = vld [vmem:[#allocation2 + $0x10] sm:$0xff]  ;;  %v87_v3 = vcvt.s32.f32 %v23_v0  ;;  %v88_v4 = vcvt.s32.f32 %v24_v1  ;;  %v26_v6 = vld [vmem:[#allocation2 + $0x18] sm:$0xff]  ;;  %v27_v7 = vld [vmem:[#allocation2 + $0x20] sm:$0xff]  ;;  %s220_s13 = sshll.u32 %s283_s0, 4  ;;  %s221_s13 = int_to_ptr.vmem [resolvable:$true] %s220_s13 }
  0x10   :  { %v89_v5 = vcvt.s32.f32 %v25_v2  ;;  %v28_v8 = vld [vmem:[#allocation2 + $0x28] sm:$0xff]  ;;  %v90_v9 = vcvt.s32.f32 %v26_v6  ;;  %v91_v10 = vcvt.s32.f32 %v27_v7  ;;  %v29_v12 = vld [vmem:[#allocation2 + $0x30] sm:$0xff]  ;;  %v30_v13 = vld [vmem:[#allocation2 + $0x38] sm:$0xff]  ;;  %s256_s14 = scalar_lea.vmem %s221_s13, 8192  ;;  %p261_p6 = scmp.lt.s32.totalorder %s221_s13, %s221_s13 }
  0x11   :  { %v92_v11 = vcvt.s32.f32 %v28_v8  ;;  %v31_v14 = vld [vmem:[#allocation2 + $0x40] sm:$0xff]  ;;  %151 = vst [vmem:[#allocation5] sm:$0xff] %v87_v3  ;;  %152 = vst [vmem:[#allocation5 + $0x8] sm:$0xff] %v88_v4  ;;  %v93_v15 = vcvt.s32.f32 %v29_v12  ;;  %v94_v16 = vcvt.s32.f32 %v30_v13  ;;  %v32_v18 = vld [vmem:[#allocation2 + $0x48] sm:$0xff]  ;;  %p257_p5 = scmp.ne.s32.totalorder %s221_s13, %s256_s14  ;;  %p262_p7 = scmp.lt.s32.totalorder %s256_s14, %s256_s14 }
  0x12   :  { %153 = vst [vmem:[#allocation5 + $0x10] sm:$0xff] %v89_v5  ;;  %v95_v17 = vcvt.s32.f32 %v31_v14  ;;  %v33_v19 = vld [vmem:[#allocation2 + $0x50] sm:$0xff]  ;;  %v34_v20 = vld [vmem:[#allocation2 + $0x58] sm:$0xff]  ;;  %154 = vst [vmem:[#allocation5 + $0x18] sm:$0xff] %v90_v9  ;;  %v96_v21 = vcvt.s32.f32 %v32_v18 }
  0x13   :  { %155 = vst [vmem:[#allocation5 + $0x20] sm:$0xff] %v91_v10  ;;  %156 = vst [vmem:[#allocation5 + $0x28] sm:$0xff] %v92_v11  ;;  %v97_v22 = vcvt.s32.f32 %v33_v19  ;;  %v98_v23 = vcvt.s32.f32 %v34_v20  ;;  %v35_v24 = vld [vmem:[#allocation2 + $0x60] sm:$0xff]  ;;  %v36_v25 = vld [vmem:[#allocation2 + $0x68] sm:$0xff]  ;;  %p263_p8 = por %p262_p7, %p261_p6 }
  0x14   :  { %v37_v26 = vld [vmem:[#allocation2 + $0x70] sm:$0xff]  ;;  %157 = vst [vmem:[#allocation5 + $0x30] sm:$0xff] %v93_v15  ;;  %158 = vst [vmem:[#allocation5 + $0x38] sm:$0xff] %v94_v16  ;;  %v99_v27 = vcvt.s32.f32 %v35_v24  ;;  %v100_v28 = vcvt.s32.f32 %v36_v25  ;;  %v38_v30 = vld [vmem:[#allocation2 + $0x78] sm:$0xff] }
  0x15   :  { %159 = vst [vmem:[#allocation5 + $0x40] sm:$0xff] %v95_v17  ;;  %v101_v29 = vcvt.s32.f32 %v37_v26  ;;  %v39_v31 = vld [vmem:[#allocation2 + $0x80] sm:$0xff]  ;;  %v40_v32 = vld [vmem:[#allocation2 + $0x88] sm:$0xff]  ;;  %160 = vst [vmem:[#allocation5 + $0x48] sm:$0xff] %v96_v21  ;;  %v102_v33 = vcvt.s32.f32 %v38_v30  ;;  %p264_p9 = pnand %p263_p8, %p257_p5 }
  0x16   :  { %161 = vst [vmem:[#allocation5 + $0x50] sm:$0xff] %v97_v22  ;;  %162 = vst [vmem:[#allocation5 + $0x58] sm:$0xff] %v98_v23  ;;  %v103_v34 = vcvt.s32.f32 %v39_v31  ;;  %v104_v35 = vcvt.s32.f32 %v40_v32  ;;  %v41_v36 = vld [vmem:[#allocation2 + $0x90] sm:$0xff]  ;;  %v42_v37 = vld [vmem:[#allocation2 + $0x98] sm:$0xff] }
  0x17   :  { %v43_v38 = vld [vmem:[#allocation2 + $0xa0] sm:$0xff]  ;;  %163 = vst [vmem:[#allocation5 + $0x60] sm:$0xff] %v99_v27  ;;  %164 = vst [vmem:[#allocation5 + $0x68] sm:$0xff] %v100_v28  ;;  %v105_v39 = vcvt.s32.f32 %v41_v36  ;;  %v106_v40 = vcvt.s32.f32 %v42_v37  ;;  %v44_v42 = vld [vmem:[#allocation2 + $0xa8] sm:$0xff] }
  0x18   :  { %165 = vst [vmem:[#allocation5 + $0x70] sm:$0xff] %v101_v29  ;;  %v107_v41 = vcvt.s32.f32 %v43_v38  ;;  %v45_v43 = vld [vmem:[#allocation2 + $0xb0] sm:$0xff]  ;;  %v46_v44 = vld [vmem:[#allocation2 + $0xb8] sm:$0xff]  ;;  %166 = vst [vmem:[#allocation5 + $0x78] sm:$0xff] %v102_v33  ;;  %v108_v45 = vcvt.s32.f32 %v44_v42 }
  0x19   :  { %167 = vst [vmem:[#allocation5 + $0x80] sm:$0xff] %v103_v34  ;;  %168 = vst [vmem:[#allocation5 + $0x88] sm:$0xff] %v104_v35  ;;  %v109_v46 = vcvt.s32.f32 %v45_v43  ;;  %v110_v47 = vcvt.s32.f32 %v46_v44  ;;  %v47_v48 = vld [vmem:[#allocation2 + $0xc0] sm:$0xff]  ;;  %v48_v49 = vld [vmem:[#allocation2 + $0xc8] sm:$0xff] }
  0x1a   :  { %v49_v50 = vld [vmem:[#allocation2 + $0xd0] sm:$0xff]  ;;  %169 = vst [vmem:[#allocation5 + $0x90] sm:$0xff] %v105_v39  ;;  %170 = vst [vmem:[#allocation5 + $0x98] sm:$0xff] %v106_v40  ;;  %v111_v51 = vcvt.s32.f32 %v47_v48  ;;  %v112_v52 = vcvt.s32.f32 %v48_v49  ;;  %v50_v54 = vld [vmem:[#allocation2 + $0xd8] sm:$0xff] }
  0x1b   :  { %171 = vst [vmem:[#allocation5 + $0xa0] sm:$0xff] %v107_v41  ;;  %v113_v53 = vcvt.s32.f32 %v49_v50  ;;  %v51_v55 = vld [vmem:[#allocation2 + $0xe0] sm:$0xff]  ;;  %v52_v56 = vld [vmem:[#allocation2 + $0xe8] sm:$0xff]  ;;  %172 = vst [vmem:[#allocation5 + $0xa8] sm:$0xff] %v108_v45  ;;  %v114_v57 = vcvt.s32.f32 %v50_v54 }
  0x1c   :  { %173 = vst [vmem:[#allocation5 + $0xb0] sm:$0xff] %v109_v46  ;;  %174 = vst [vmem:[#allocation5 + $0xb8] sm:$0xff] %v110_v47  ;;  %v115_v58 = vcvt.s32.f32 %v51_v55  ;;  %v116_v59 = vcvt.s32.f32 %v52_v56  ;;  %v53_v60 = vld [vmem:[#allocation2 + $0xf0] sm:$0xff]  ;;  %v54_v61 = vld [vmem:[#allocation2 + $0xf8] sm:$0xff] }
  0x1d   :  { %v55_v62 = vld [vmem:[#allocation2 + $0x100] sm:$0xff]  ;;  %175 = vst [vmem:[#allocation5 + $0xc0] sm:$0xff] %v111_v51  ;;  %176 = vst [vmem:[#allocation5 + $0xc8] sm:$0xff] %v112_v52  ;;  %v117_v63 = vcvt.s32.f32 %v53_v60  ;;  %v118_v0 = vcvt.s32.f32 %v54_v61  ;;  %v56_v2 = vld [vmem:[#allocation2 + $0x108] sm:$0xff] }
  0x1e   :  { %177 = vst [vmem:[#allocation5 + $0xd0] sm:$0xff] %v113_v53  ;;  %v119_v1 = vcvt.s32.f32 %v55_v62  ;;  %v57_v3 = vld [vmem:[#allocation2 + $0x110] sm:$0xff]  ;;  %v58_v4 = vld [vmem:[#allocation2 + $0x118] sm:$0xff]  ;;  %178 = vst [vmem:[#allocation5 + $0xd8] sm:$0xff] %v114_v57  ;;  %v120_v5 = vcvt.s32.f32 %v56_v2 }
  0x1f   :  { %179 = vst [vmem:[#allocation5 + $0xe0] sm:$0xff] %v115_v58  ;;  %180 = vst [vmem:[#allocation5 + $0xe8] sm:$0xff] %v116_v59  ;;  %v121_v6 = vcvt.s32.f32 %v57_v3  ;;  %v122_v7 = vcvt.s32.f32 %v58_v4  ;;  %v59_v8 = vld [vmem:[#allocation2 + $0x120] sm:$0xff]  ;;  %v60_v9 = vld [vmem:[#allocation2 + $0x128] sm:$0xff] }
  0x20   :  { %v61_v10 = vld [vmem:[#allocation2 + $0x130] sm:$0xff]  ;;  %181 = vst [vmem:[#allocation5 + $0xf0] sm:$0xff] %v117_v63  ;;  %182 = vst [vmem:[#allocation5 + $0xf8] sm:$0xff] %v118_v0  ;;  %v123_v11 = vcvt.s32.f32 %v59_v8  ;;  %v124_v12 = vcvt.s32.f32 %v60_v9  ;;  %v62_v14 = vld [vmem:[#allocation2 + $0x138] sm:$0xff] }
  0x21   :  { %183 = vst [vmem:[#allocation5 + $0x100] sm:$0xff] %v119_v1  ;;  %v125_v13 = vcvt.s32.f32 %v61_v10  ;;  %v63_v15 = vld [vmem:[#allocation2 + $0x140] sm:$0xff]  ;;  %v64_v16 = vld [vmem:[#allocation2 + $0x148] sm:$0xff]  ;;  %184 = vst [vmem:[#allocation5 + $0x108] sm:$0xff] %v120_v5  ;;  %v126_v17 = vcvt.s32.f32 %v62_v14 }
  0x22   :  { %185 = vst [vmem:[#allocation5 + $0x110] sm:$0xff] %v121_v6  ;;  %186 = vst [vmem:[#allocation5 + $0x118] sm:$0xff] %v122_v7  ;;  %v127_v18 = vcvt.s32.f32 %v63_v15  ;;  %v128_v19 = vcvt.s32.f32 %v64_v16  ;;  %v65_v20 = vld [vmem:[#allocation2 + $0x150] sm:$0xff]  ;;  %v66_v21 = vld [vmem:[#allocation2 + $0x158] sm:$0xff] }
  0x23   :  { %v67_v22 = vld [vmem:[#allocation2 + $0x160] sm:$0xff]  ;;  %187 = vst [vmem:[#allocation5 + $0x120] sm:$0xff] %v123_v11  ;;  %188 = vst [vmem:[#allocation5 + $0x128] sm:$0xff] %v124_v12  ;;  %v129_v23 = vcvt.s32.f32 %v65_v20  ;;  %v130_v24 = vcvt.s32.f32 %v66_v21  ;;  %v68_v26 = vld [vmem:[#allocation2 + $0x168] sm:$0xff] }
  0x24   :  { %189 = vst [vmem:[#allocation5 + $0x130] sm:$0xff] %v125_v13  ;;  %v131_v25 = vcvt.s32.f32 %v67_v22  ;;  %v69_v27 = vld [vmem:[#allocation2 + $0x170] sm:$0xff]  ;;  %v70_v28 = vld [vmem:[#allocation2 + $0x178] sm:$0xff]  ;;  %190 = vst [vmem:[#allocation5 + $0x138] sm:$0xff] %v126_v17  ;;  %v132_v29 = vcvt.s32.f32 %v68_v26 }
  0x25   :  { %191 = vst [vmem:[#allocation5 + $0x140] sm:$0xff] %v127_v18  ;;  %192 = vst [vmem:[#allocation5 + $0x148] sm:$0xff] %v128_v19  ;;  %v133_v30 = vcvt.s32.f32 %v69_v27  ;;  %v134_v31 = vcvt.s32.f32 %v70_v28  ;;  %v71_v32 = vld [vmem:[#allocation2 + $0x180] sm:$0xff]  ;;  %v72_v33 = vld [vmem:[#allocation2 + $0x188] sm:$0xff] }
  0x26   :  { %v73_v34 = vld [vmem:[#allocation2 + $0x190] sm:$0xff]  ;;  %193 = vst [vmem:[#allocation5 + $0x150] sm:$0xff] %v129_v23  ;;  %194 = vst [vmem:[#allocation5 + $0x158] sm:$0xff] %v130_v24  ;;  %v135_v35 = vcvt.s32.f32 %v71_v32  ;;  %v136_v36 = vcvt.s32.f32 %v72_v33  ;;  %v74_v38 = vld [vmem:[#allocation2 + $0x198] sm:$0xff] }
  0x27   :  { %195 = vst [vmem:[#allocation5 + $0x160] sm:$0xff] %v131_v25  ;;  %v137_v37 = vcvt.s32.f32 %v73_v34  ;;  %v75_v39 = vld [vmem:[#allocation2 + $0x1a0] sm:$0xff]  ;;  %v76_v40 = vld [vmem:[#allocation2 + $0x1a8] sm:$0xff]  ;;  %196 = vst [vmem:[#allocation5 + $0x168] sm:$0xff] %v132_v29  ;;  %v138_v41 = vcvt.s32.f32 %v74_v38 }
  0x28   :  { %197 = vst [vmem:[#allocation5 + $0x170] sm:$0xff] %v133_v30  ;;  %198 = vst [vmem:[#allocation5 + $0x178] sm:$0xff] %v134_v31  ;;  %v139_v42 = vcvt.s32.f32 %v75_v39  ;;  %v140_v43 = vcvt.s32.f32 %v76_v40  ;;  %v77_v44 = vld [vmem:[#allocation2 + $0x1b0] sm:$0xff]  ;;  %v78_v45 = vld [vmem:[#allocation2 + $0x1b8] sm:$0xff] }
  0x29   :  { %v79_v46 = vld [vmem:[#allocation2 + $0x1c0] sm:$0xff]  ;;  %199 = vst [vmem:[#allocation5 + $0x180] sm:$0xff] %v135_v35  ;;  %200 = vst [vmem:[#allocation5 + $0x188] sm:$0xff] %v136_v36  ;;  %v141_v47 = vcvt.s32.f32 %v77_v44  ;;  %v142_v48 = vcvt.s32.f32 %v78_v45  ;;  %v80_v50 = vld [vmem:[#allocation2 + $0x1c8] sm:$0xff] }
  0x2a   :  { %201 = vst [vmem:[#allocation5 + $0x190] sm:$0xff] %v137_v37  ;;  %v143_v49 = vcvt.s32.f32 %v79_v46  ;;  %v81_v51 = vld [vmem:[#allocation2 + $0x1d0] sm:$0xff]  ;;  %v82_v52 = vld [vmem:[#allocation2 + $0x1d8] sm:$0xff]  ;;  %202 = vst [vmem:[#allocation5 + $0x198] sm:$0xff] %v138_v41  ;;  %v144_v53 = vcvt.s32.f32 %v80_v50 }
  0x2b   :  { %203 = vst [vmem:[#allocation5 + $0x1a0] sm:$0xff] %v139_v42  ;;  %204 = vst [vmem:[#allocation5 + $0x1a8] sm:$0xff] %v140_v43  ;;  %v145_v54 = vcvt.s32.f32 %v81_v51  ;;  %v146_v55 = vcvt.s32.f32 %v82_v52  ;;  %v83_v56 = vld [vmem:[#allocation2 + $0x1e0] sm:$0xff]  ;;  %v84_v57 = vld [vmem:[#allocation2 + $0x1e8] sm:$0xff] }
  0x2c   :  { %v85_v58 = vld [vmem:[#allocation2 + $0x1f0] sm:$0xff]  ;;  %205 = vst [vmem:[#allocation5 + $0x1b0] sm:$0xff] %v141_v47  ;;  %206 = vst [vmem:[#allocation5 + $0x1b8] sm:$0xff] %v142_v48  ;;  %v147_v59 = vcvt.s32.f32 %v83_v56  ;;  %v148_v60 = vcvt.s32.f32 %v84_v57  ;;  %v86_v62 = vld [vmem:[#allocation2 + $0x1f8] sm:$0xff] }
  0x2d   :  { %207 = vst [vmem:[#allocation5 + $0x1c0] sm:$0xff] %v143_v49  ;;  %v149_v61 = vcvt.s32.f32 %v85_v58  ;;  %208 = vst [vmem:[#allocation5 + $0x1c8] sm:$0xff] %v144_v53  ;;  %v150_v63 = vcvt.s32.f32 %v86_v62 }
  0x2e   :  { %209 = vst [vmem:[#allocation5 + $0x1d0] sm:$0xff] %v145_v54  ;;  %210 = vst [vmem:[#allocation5 + $0x1d8] sm:$0xff] %v146_v55 }
  0x2f   :  { %211 = vst [vmem:[#allocation5 + $0x1e0] sm:$0xff] %v147_v59  ;;  %212 = vst [vmem:[#allocation5 + $0x1e8] sm:$0xff] %v148_v60 }
  0x30   :  { %213 = vst [vmem:[#allocation5 + $0x1f0] sm:$0xff] %v149_v61  ;;  %214 = vst [vmem:[#allocation5 + $0x1f8] sm:$0xff] %v150_v63 }
  0x31   :  { %267 = shalt.err (!%p264_p9)
}
  0x32   :  { %226 = dma.vmem_to_hbm [thread:$0]  %s221_s13, 8192, %s307_s1, [#allocation4], %s281_s9, %s281_s9, %s282_s10  }
  0x33   :  { %278 = dma.done.wait [#allocation4], 8192  }
  0x34   :  { %279 = vsyncadd [#allocation4], 4294959104 }
  0x35   :  { %230 = vsyncpa [#allocation3], 1 }
  0x36   :  { %231 = vsyncpa [#allocation4], 1 }

</bundles_post_ra>
